<compile_context>
chip_gen: v7x
topology: tpu7x:2x2x1
jax: 0.10.0
libtpu: 0.0.40
codegen_flags: <defaults>
</compile_context>

<pallas_src>
import functools

import jax
import jax.numpy as jnp
from jax.experimental import pallas as pl
from jax.experimental.pallas import tpu as pltpu

BN_EPS = 1e-5


def _round_up(v, m):
    return (v + m - 1) // m * m


def _stats_kernel(m_real, tile_m, num_m,
                  g_ref, x_ref, wg_ref, bg_ref, wx_ref, bx_ref, wpsi_ref,
                  gam_g_ref, bet_g_ref, gam_x_ref, bet_x_ref, psi_sc_ref,
                  gx_aff_ref, psi_aff_ref,
                  sum_g, ssq_g, sum_x, ssq_x, sum_p, ssq_p):
    pss = pl.program_id(0)   # 0: branch stats, 1: psi stats + emit affine
    mi = pl.program_id(1)    # M tile

    @pl.when(jnp.logical_and(pss == 0, mi == 0))
    def _():
        sum_g[...] = jnp.zeros_like(sum_g)
        ssq_g[...] = jnp.zeros_like(ssq_g)
        sum_x[...] = jnp.zeros_like(sum_x)
        ssq_x[...] = jnp.zeros_like(ssq_x)
        sum_p[...] = jnp.zeros_like(sum_p)
        ssq_p[...] = jnp.zeros_like(ssq_p)

    # Lane-validity mask for a (possibly) padded last tile; stats stay exact.
    col = mi * tile_m + jax.lax.broadcasted_iota(jnp.int32, (1, tile_m), 1)
    mask = (col < m_real).astype(jnp.float32)                 # (1, tile_m)

    g = g_ref[...].astype(jnp.float32)                        # (F_g, tile_m)
    x = x_ref[...].astype(jnp.float32)                        # (F_l, tile_m)
    # 1x1 convs as channel-major matmuls (lane-wide MXU output).
    g1 = jnp.dot(wg_ref[...], g, preferred_element_type=jnp.float32) + bg_ref[...]
    x1 = jnp.dot(wx_ref[...], x, preferred_element_type=jnp.float32) + bx_ref[...]

    @pl.when(pss == 0)
    def _():
        gm = g1 * mask
        xm = x1 * mask
        sum_g[...] += jnp.sum(gm, axis=1, keepdims=True)
        ssq_g[...] += jnp.sum(gm * g1, axis=1, keepdims=True)
        sum_x[...] += jnp.sum(xm, axis=1, keepdims=True)
        ssq_x[...] += jnp.sum(xm * x1, axis=1, keepdims=True)

    @pl.when(pss == 1)
    def _():
        inv_m = jnp.float32(1.0 / m_real)
        mean_g = sum_g[...] * inv_m
        var_g = ssq_g[...] * inv_m - mean_g * mean_g
        scale_g = gam_g_ref[...] * jax.lax.rsqrt(var_g + BN_EPS)
        shift_g = bet_g_ref[...] - mean_g * scale_g
        mean_x = sum_x[...] * inv_m
        var_x = ssq_x[...] * inv_m - mean_x * mean_x
        scale_x = gam_x_ref[...] * jax.lax.rsqrt(var_x + BN_EPS)
        shift_x = bet_x_ref[...] - mean_x * scale_x

        p = jnp.maximum(g1 * scale_g + shift_g + x1 * scale_x + shift_x, 0.0)
        # psi 1x1 conv to a single channel: VPU multiply + sublane reduce
        # (an MXU matmul with a 1-column output would waste a full push/pop).
        psi = jnp.sum(p * wpsi_ref[...], axis=0, keepdims=True) + psi_sc_ref[0]
        pm = psi * mask
        sum_p[...] += jnp.sum(pm, axis=1, keepdims=True)
        ssq_p[...] += jnp.sum(pm * psi, axis=1, keepdims=True)

        @pl.when(mi == num_m - 1)
        def _():
            gx_aff_ref[...] = jnp.concatenate(
                [scale_g, shift_g, scale_x, shift_x], axis=1)
            mean_p = sum_p[...] * inv_m
            var_p = ssq_p[...] * inv_m - mean_p * mean_p
            p_scale = psi_sc_ref[1] * jax.lax.rsqrt(var_p + BN_EPS)
            p_shift = psi_sc_ref[2] - mean_p * p_scale
            psi_aff_ref[...] = jnp.concatenate([p_scale, p_shift], axis=1)


def _apply_kernel(g_ref, x_ref, wg_ref, bg_ref, wx_ref, bx_ref, wpsi_ref,
                  gx_aff_ref, psi_aff_ref, psi_sc_ref, out_ref):
    g = g_ref[...].astype(jnp.float32)                        # (F_g, tile_m)
    x = x_ref[...].astype(jnp.float32)                        # (F_l, tile_m)
    g1 = jnp.dot(wg_ref[...], g, preferred_element_type=jnp.float32) + bg_ref[...]
    x1 = jnp.dot(wx_ref[...], x, preferred_element_type=jnp.float32) + bx_ref[...]

    scale_g = gx_aff_ref[:, 0:1]
    shift_g = gx_aff_ref[:, 1:2]
    scale_x = gx_aff_ref[:, 2:3]
    shift_x = gx_aff_ref[:, 3:4]

    p = jnp.maximum(g1 * scale_g + shift_g + x1 * scale_x + shift_x, 0.0)
    psi = jnp.sum(p * wpsi_ref[...], axis=0, keepdims=True) + psi_sc_ref[0]
    psi = jax.nn.sigmoid(psi * psi_aff_ref[0:1, 0:1] + psi_aff_ref[0:1, 1:2])
    out_ref[...] = (x * psi).astype(out_ref.dtype)            # lane-dense store


def attention_block(g, x, params, *, tile_m=1024):
    """g: (N, F_g, H, W), x: (N, F_l, H, W) -- NCHW, like the PyTorch module."""
    N, F_g, H, W = g.shape
    _, F_l, _, _ = x.shape
    F_int = params["w_g"].shape[0]
    M = N * H * W

    # NCHW -> (C, N*H*W): only small leading N/C axes move; HW stays contiguous.
    g2 = jnp.transpose(g.reshape(N, F_g, H * W), (1, 0, 2)).reshape(F_g, M)
    x2 = jnp.transpose(x.reshape(N, F_l, H * W), (1, 0, 2)).reshape(F_l, M)

    # Tile over M (lane axis); must be a multiple of 128.
    tile_m = max(128, (int(tile_m) // 128) * 128)
    tile_m = min(tile_m, _round_up(M, 128))
    num_m = (M + tile_m - 1) // tile_m
    m_pad = num_m * tile_m
    if m_pad != M:
        g2 = jnp.pad(g2, ((0, 0), (0, m_pad - M)))
        x2 = jnp.pad(x2, ((0, 0), (0, m_pad - M)))

    # psi-branch (1,1) scalars -> SMEM: [conv bias, BN gamma, BN beta]
    psi_scalars = jnp.concatenate([
        params["b_psi"].reshape(-1),
        params["bn_p_gamma"].reshape(-1),
        params["bn_p_beta"].reshape(-1),
    ]).astype(jnp.float32)

    smem_spec = pl.BlockSpec(memory_space=pltpu.MemorySpace.SMEM)

    # --------- kernel 1: global BN statistics -> folded scale/shift ---------
    gx_aff, psi_aff = pl.pallas_call(
        functools.partial(_stats_kernel, M, tile_m, num_m),
        grid=(2, num_m),
        in_specs=[
            pl.BlockSpec((F_g, tile_m), lambda p, m: (0, m)),
            pl.BlockSpec((F_l, tile_m), lambda p, m: (0, m)),
            pl.BlockSpec((F_int, F_g), lambda p, m: (0, 0)),   # w_g
            pl.BlockSpec((F_int, 1), lambda p, m: (0, 0)),     # b_g
            pl.BlockSpec((F_int, F_l), lambda p, m: (0, 0)),   # w_x
            pl.BlockSpec((F_int, 1), lambda p, m: (0, 0)),     # b_x
            pl.BlockSpec((F_int, 1), lambda p, m: (0, 0)),     # w_psi
            pl.BlockSpec((F_int, 1), lambda p, m: (0, 0)),     # bn_g gamma
            pl.BlockSpec((F_int, 1), lambda p, m: (0, 0)),     # bn_g beta
            pl.BlockSpec((F_int, 1), lambda p, m: (0, 0)),     # bn_x gamma
            pl.BlockSpec((F_int, 1), lambda p, m: (0, 0)),     # bn_x beta
            smem_spec,                                         # psi scalars
        ],
        out_specs=(pl.BlockSpec((F_int, 4), lambda p, m: (0, 0)),
                   pl.BlockSpec((1, 2), lambda p, m: (0, 0))),
        out_shape=(jax.ShapeDtypeStruct((F_int, 4), jnp.float32),
                   jax.ShapeDtypeStruct((1, 2), jnp.float32)),
        scratch_shapes=[pltpu.VMEM((F_int, 1), jnp.float32)] * 4
                       + [pltpu.VMEM((1, 1), jnp.float32)] * 2,
        compiler_params=pltpu.CompilerParams(
            dimension_semantics=("arbitrary", "arbitrary"),
            vmem_limit_bytes=32 * 1024 * 1024),
    )(g2, x2, params["w_g"], params["b_g"], params["w_x"], params["b_x"],
      params["w_psi"], params["bn_g_gamma"], params["bn_g_beta"],
      params["bn_x_gamma"], params["bn_x_beta"], psi_scalars)

    # --------- kernel 2: normalize + relu + psi + sigmoid + gate ------------
    out2 = pl.pallas_call(
        _apply_kernel,
        grid=(num_m,),
        in_specs=[
            pl.BlockSpec((F_g, tile_m), lambda m: (0, m)),
            pl.BlockSpec((F_l, tile_m), lambda m: (0, m)),
            pl.BlockSpec((F_int, F_g), lambda m: (0, 0)),      # w_g
            pl.BlockSpec((F_int, 1), lambda m: (0, 0)),        # b_g
            pl.BlockSpec((F_int, F_l), lambda m: (0, 0)),      # w_x
            pl.BlockSpec((F_int, 1), lambda m: (0, 0)),        # b_x
            pl.BlockSpec((F_int, 1), lambda m: (0, 0)),        # w_psi
            pl.BlockSpec((F_int, 4), lambda m: (0, 0)),        # folded BN g/x
            pl.BlockSpec((1, 2), lambda m: (0, 0)),            # folded BN psi
            smem_spec,                                         # psi scalars
        ],
        out_specs=pl.BlockSpec((F_l, tile_m), lambda m: (0, m)),
        out_shape=jax.ShapeDtypeStruct((F_l, m_pad), x.dtype),
        compiler_params=pltpu.CompilerParams(
            dimension_semantics=("parallel",),
            vmem_limit_bytes=32 * 1024 * 1024),
    )(g2, x2, params["w_g"], params["b_g"], params["w_x"], params["b_x"],
      params["w_psi"], gx_aff, psi_aff, psi_scalars)

    out = out2[:, :M].reshape(F_l, N, H, W)
    return jnp.transpose(out, (1, 0, 2, 3))


def make_params(key, F_g, F_l, F_int, dtype=jnp.float32):
    ks = jax.random.split(key, 10)
    return {
        # 1x1 conv weights stored channel-major (Cout, Cin); biases (Cout, 1)
        "w_g": jax.random.normal(ks[0], (F_int, F_g), dtype) * 0.2,
        "b_g": jax.random.normal(ks[1], (F_int, 1), dtype) * 0.1,
        "w_x": jax.random.normal(ks[2], (F_int, F_l), dtype) * 0.2,
        "b_x": jax.random.normal(ks[3], (F_int, 1), dtype) * 0.1,
        "w_psi": jax.random.normal(ks[4], (F_int, 1), dtype) * 0.2,
        "b_psi": jax.random.normal(ks[5], (1, 1), dtype) * 0.1,
        "bn_g_gamma": 1.0 + 0.1 * jax.random.normal(ks[6], (F_int, 1), dtype),
        "bn_g_beta": 0.1 * jax.random.normal(ks[7], (F_int, 1), dtype),
        "bn_x_gamma": 1.0 + 0.1 * jax.random.normal(ks[8], (F_int, 1), dtype),
        "bn_x_beta": 0.1 * jax.random.normal(ks[9], (F_int, 1), dtype),
        "bn_p_gamma": jnp.full((1, 1), 1.05, dtype),
        "bn_p_beta": jnp.full((1, 1), -0.02, dtype),
    }


def reference_forward(g, x, params):
    """Pure-JAX reference mirroring the PyTorch module (training-mode BN)."""
    N, F_g, H, W = g.shape
    _, F_l, _, _ = x.shape
    M = N * H * W
    g2 = jnp.transpose(g.reshape(N, F_g, H * W), (1, 0, 2)).reshape(F_g, M)
    x2 = jnp.transpose(x.reshape(N, F_l, H * W), (1, 0, 2)).reshape(F_l, M)
    g2 = g2.astype(jnp.float32)
    x2 = x2.astype(jnp.float32)

    def bn(y, gamma, beta):  # y: (C, M); training-mode, biased variance
        mean = jnp.mean(y, axis=1, keepdims=True)
        var = jnp.mean((y - mean) ** 2, axis=1, keepdims=True)
        return (y - mean) / jnp.sqrt(var + BN_EPS) * gamma + beta

    g1 = bn(params["w_g"] @ g2 + params["b_g"],
            params["bn_g_gamma"], params["bn_g_beta"])
    x1 = bn(params["w_x"] @ x2 + params["b_x"],
            params["bn_x_gamma"], params["bn_x_beta"])
    p = jnp.maximum(g1 + x1, 0.0)
    psi = bn(params["w_psi"].T @ p + params["b_psi"],
             params["bn_p_gamma"], params["bn_p_beta"])
    psi = jax.nn.sigmoid(psi)
    out = (x2 * psi).reshape(F_l, N, H, W)
    return jnp.transpose(out, (1, 0, 2, 3)).astype(x.dtype)


if __name__ == "__main__":
    # Small shapes consistent with the module: N=2, F_g=F_l=4, F_int=8, H=W=16
    N, F_g, F_l, F_int, H, W = 2, 4, 4, 8, 16, 16

    key = jax.random.PRNGKey(0)
    k_g, k_x, k_p = jax.random.split(key, 3)
    g = jax.random.normal(k_g, (N, F_g, H, W), jnp.float32)
    x = jax.random.normal(k_x, (N, F_l, H, W), jnp.float32)
    params = make_params(k_p, F_g, F_l, F_int)

    # Small tile so the test exercises multi-tile stat accumulation + pipelining.
    out = attention_block(g, x, params, tile_m=128)
    out = jax.block_until_ready(out)

    ref = reference_forward(g, x, params)
    assert out.shape == (N, F_l, H, W), out.shape
    err = float(jnp.max(jnp.abs(out.astype(jnp.float32) - ref.astype(jnp.float32))))
    assert err < 5e-4, err

    print("KERNEL_OK")
</pallas_src>

<mosaic_0001>
module attributes {stable_mosaic.version = 11 : i64} {
  func.func @_stats_kernel(%arg0: i32, %arg1: i32, %arg2: memref<4x128xf32, #tpu.memory_space<vmem>>, %arg3: memref<4x128xf32, #tpu.memory_space<vmem>>, %arg4: memref<8x4xf32, #tpu.memory_space<vmem>>, %arg5: memref<8x1xf32, #tpu.memory_space<vmem>>, %arg6: memref<8x4xf32, #tpu.memory_space<vmem>>, %arg7: memref<8x1xf32, #tpu.memory_space<vmem>>, %arg8: memref<8x1xf32, #tpu.memory_space<vmem>>, %arg9: memref<8x1xf32, #tpu.memory_space<vmem>>, %arg10: memref<8x1xf32, #tpu.memory_space<vmem>>, %arg11: memref<8x1xf32, #tpu.memory_space<vmem>>, %arg12: memref<8x1xf32, #tpu.memory_space<vmem>>, %arg13: memref<3xf32, #tpu.memory_space<smem>>, %arg14: memref<8x4xf32, #tpu.memory_space<vmem>>, %arg15: memref<1x2xf32, #tpu.memory_space<vmem>>, %arg16: memref<8x1xf32, #tpu.memory_space<vmem>>, %arg17: memref<8x1xf32, #tpu.memory_space<vmem>>, %arg18: memref<8x1xf32, #tpu.memory_space<vmem>>, %arg19: memref<8x1xf32, #tpu.memory_space<vmem>>, %arg20: memref<1x1xf32, #tpu.memory_space<vmem>>, %arg21: memref<1x1xf32, #tpu.memory_space<vmem>>) attributes {dimension_semantics = [#tpu.dimension_semantics<arbitrary>, #tpu.dimension_semantics<arbitrary>], iteration_bounds = array<i64: 2, 4>, scalar_prefetch = 0 : i64, scratch_operands = 6 : i64, tpu.core_type = #tpu.core_type<tc>, window_params = [{transform_indices = @transform_0, window_bounds = array<i64: 4, 128>}, {transform_indices = @transform_1, window_bounds = array<i64: 4, 128>}, {pipeline_mode = #tpu.pipeline_mode<synchronous>, transform_indices = @transform_2, window_bounds = array<i64: 8, 4>}, {pipeline_mode = #tpu.pipeline_mode<synchronous>, transform_indices = @transform_3, window_bounds = array<i64: 8, 1>}, {pipeline_mode = #tpu.pipeline_mode<synchronous>, transform_indices = @transform_4, window_bounds = array<i64: 8, 4>}, {pipeline_mode = #tpu.pipeline_mode<synchronous>, transform_indices = @transform_5, window_bounds = array<i64: 8, 1>}, {pipeline_mode = #tpu.pipeline_mode<synchronous>, transform_indices = @transform_6, window_bounds = array<i64: 8, 1>}, {pipeline_mode = #tpu.pipeline_mode<synchronous>, transform_indices = @transform_7, window_bounds = array<i64: 8, 1>}, {pipeline_mode = #tpu.pipeline_mode<synchronous>, transform_indices = @transform_8, window_bounds = array<i64: 8, 1>}, {pipeline_mode = #tpu.pipeline_mode<synchronous>, transform_indices = @transform_9, window_bounds = array<i64: 8, 1>}, {pipeline_mode = #tpu.pipeline_mode<synchronous>, transform_indices = @transform_10, window_bounds = array<i64: 8, 1>}, {transform_indices = @transform_11, window_bounds = array<i64: 3>}, {pipeline_mode = #tpu.pipeline_mode<synchronous>, transform_indices = @transform_12, window_bounds = array<i64: 8, 4>}, {pipeline_mode = #tpu.pipeline_mode<synchronous>, transform_indices = @transform_13, window_bounds = array<i64: 1, 2>}]} {
    %c0_i32 = arith.constant 0 : i32
    %0 = arith.cmpi eq, %arg0, %c0_i32 : i32
    %c0_i32_0 = arith.constant 0 : i32
    %1 = arith.cmpi eq, %arg1, %c0_i32_0 : i32
    %2 = arith.andi %0, %1 : i1
    %3 = arith.extui %2 : i1 to i32
    %c0_i32_1 = arith.constant 0 : i32
    %4 = arith.cmpi ne, %3, %c0_i32_1 : i32
    scf.if %4 {
      %cst_17 = arith.constant 0.000000e+00 : f32
      %31 = vector.broadcast %cst_17 : f32 to vector<8x1xf32>
      %c0_18 = arith.constant 0 : index
      %c0_19 = arith.constant 0 : index
      %32 = vector.load %arg16[%c0_18, %c0_19] : memref<8x1xf32, #tpu.memory_space<vmem>>, vector<8x1xf32>
      tpu.vector_store %arg16[%c0_18, %c0_19], %31 {strides = array<i32>} : memref<8x1xf32, #tpu.memory_space<vmem>>, vector<8x1xf32>,
      %cst_20 = arith.constant 0.000000e+00 : f32
      %33 = vector.broadcast %cst_20 : f32 to vector<8x1xf32>
      %c0_21 = arith.constant 0 : index
      %c0_22 = arith.constant 0 : index
      %34 = vector.load %arg17[%c0_21, %c0_22] : memref<8x1xf32, #tpu.memory_space<vmem>>, vector<8x1xf32>
      tpu.vector_store %arg17[%c0_21, %c0_22], %33 {strides = array<i32>} : memref<8x1xf32, #tpu.memory_space<vmem>>, vector<8x1xf32>,
      %cst_23 = arith.constant 0.000000e+00 : f32
      %35 = vector.broadcast %cst_23 : f32 to vector<8x1xf32>
      %c0_24 = arith.constant 0 : index
      %c0_25 = arith.constant 0 : index
      %36 = vector.load %arg18[%c0_24, %c0_25] : memref<8x1xf32, #tpu.memory_space<vmem>>, vector<8x1xf32>
      tpu.vector_store %arg18[%c0_24, %c0_25], %35 {strides = array<i32>} : memref<8x1xf32, #tpu.memory_space<vmem>>, vector<8x1xf32>,
      %cst_26 = arith.constant 0.000000e+00 : f32
      %37 = vector.broadcast %cst_26 : f32 to vector<8x1xf32>
      %c0_27 = arith.constant 0 : index
      %c0_28 = arith.constant 0 : index
      %38 = vector.load %arg19[%c0_27, %c0_28] : memref<8x1xf32, #tpu.memory_space<vmem>>, vector<8x1xf32>
      tpu.vector_store %arg19[%c0_27, %c0_28], %37 {strides = array<i32>} : memref<8x1xf32, #tpu.memory_space<vmem>>, vector<8x1xf32>,
      %cst_29 = arith.constant 0.000000e+00 : f32
      %39 = vector.broadcast %cst_29 : f32 to vector<1x1xf32>
      %c0_30 = arith.constant 0 : index
      %c0_31 = arith.constant 0 : index
      %40 = vector.load %arg20[%c0_30, %c0_31] : memref<1x1xf32, #tpu.memory_space<vmem>>, vector<1x1xf32>
      tpu.vector_store %arg20[%c0_30, %c0_31], %39 {strides = array<i32>} : memref<1x1xf32, #tpu.memory_space<vmem>>, vector<1x1xf32>,
      %cst_32 = arith.constant 0.000000e+00 : f32
      %41 = vector.broadcast %cst_32 : f32 to vector<1x1xf32>
      %c0_33 = arith.constant 0 : index
      %c0_34 = arith.constant 0 : index
      %42 = vector.load %arg21[%c0_33, %c0_34] : memref<1x1xf32, #tpu.memory_space<vmem>>, vector<1x1xf32>
      tpu.vector_store %arg21[%c0_33, %c0_34], %41 {strides = array<i32>} : memref<1x1xf32, #tpu.memory_space<vmem>>, vector<1x1xf32>,
    } else {
    }
    %c128_i32 = arith.constant 128 : i32
    %5 = arith.muli %arg1, %c128_i32 : i32
    %6 = tpu.iota {dimensions = array<i32: 1>} : vector<1x128xi32>
    %7 = vector.broadcast %5 : i32 to vector<1x128xi32>
    %8 = arith.addi %7, %6 : vector<1x128xi32>
    %c512_i32 = arith.constant 512 : i32
    %9 = vector.broadcast %c512_i32 : i32 to vector<1x128xi32>
    %10 = arith.cmpi slt, %8, %9 : vector<1x128xi32>
    %11 = arith.extui %10 : vector<1x128xi1> to vector<1x128xi32>
    %12 = arith.sitofp %11 : vector<1x128xi32> to vector<1x128xf32>
    %c0 = arith.constant 0 : index
    %c0_2 = arith.constant 0 : index
    %13 = vector.load %arg2[%c0, %c0_2] : memref<4x128xf32, #tpu.memory_space<vmem>>, vector<4x128xf32>
    %c0_3 = arith.constant 0 : index
    %c0_4 = arith.constant 0 : index
    %14 = vector.load %arg3[%c0_3, %c0_4] : memref<4x128xf32, #tpu.memory_space<vmem>>, vector<4x128xf32>
    %c0_5 = arith.constant 0 : index
    %c0_6 = arith.constant 0 : index
    %15 = vector.load %arg4[%c0_5, %c0_6] : memref<8x4xf32, #tpu.memory_space<vmem>>, vector<8x4xf32>
    %cst = arith.constant dense<0.000000e+00> : vector<8x128xf32>
    %16 = tpu.matmul %15, %13, %cst {dimension_numbers = #tpu.dot_dimension_numbers<[1], [0], [0], [1], [0, 0, 1, 1], [], []>} : vector<8x4xf32>, vector<4x128xf32>, vector<8x128xf32> -> vector<8x128xf32>
    %c0_7 = arith.constant 0 : index
    %c0_8 = arith.constant 0 : index
    %17 = vector.load %arg5[%c0_7, %c0_8] : memref<8x1xf32, #tpu.memory_space<vmem>>, vector<8x1xf32>
    %18 = vector.broadcast %17 : vector<8x1xf32> to vector<8x128xf32>
    %19 = arith.addf %16, %18 : vector<8x128xf32>
    %c0_9 = arith.constant 0 : index
    %c0_10 = arith.constant 0 : index
    %20 = vector.load %arg6[%c0_9, %c0_10] : memref<8x4xf32, #tpu.memory_space<vmem>>, vector<8x4xf32>
    %cst_11 = arith.constant dense<0.000000e+00> : vector<8x128xf32>
    %21 = tpu.matmul %20, %14, %cst_11 {dimension_numbers = #tpu.dot_dimension_numbers<[1], [0], [0], [1], [0, 0, 1, 1], [], []>} : vector<8x4xf32>, vector<4x128xf32>, vector<8x128xf32> -> vector<8x128xf32>
    %c0_12 = arith.constant 0 : index
    %c0_13 = arith.constant 0 : index
    %22 = vector.load %arg7[%c0_12, %c0_13] : memref<8x1xf32, #tpu.memory_space<vmem>>, vector<8x1xf32>
    %23 = vector.broadcast %22 : vector<8x1xf32> to vector<8x128xf32>
    %24 = arith.addf %21, %23 : vector<8x128xf32>
    %c0_i32_14 = arith.constant 0 : i32
    %25 = arith.cmpi eq, %arg0, %c0_i32_14 : i32
    %26 = arith.extui %25 : i1 to i32
    %c0_i32_15 = arith.constant 0 : i32
    %27 = arith.cmpi ne, %26, %c0_i32_15 : i32
    scf.if %27 {
      %31 = vector.broadcast %12 : vector<1x128xf32> to vector<8x128xf32>
      %32 = arith.mulf %19, %31 : vector<8x128xf32>
      %33 = vector.broadcast %12 : vector<1x128xf32> to vector<8x128xf32>
      %34 = arith.mulf %24, %33 : vector<8x128xf32>
      %c0_17 = arith.constant 0 : index
      %c0_18 = arith.constant 0 : index
      %35 = vector.load %arg16[%c0_17, %c0_18] : memref<8x1xf32, #tpu.memory_space<vmem>>, vector<8x1xf32>
      %cst_19 = arith.constant dense<0.000000e+00> : vector<8xf32>
      %36 = vector.multi_reduction <add>, %32, %cst_19 [1] : vector<8x128xf32> to vector<8xf32>
      %37 = vector.shape_cast %36 : vector<8xf32> to vector<8x1xf32>
      %38 = arith.addf %35, %37 : vector<8x1xf32>
      %c0_20 = arith.constant 0 : index
      %c0_21 = arith.constant 0 : index
      %39 = vector.load %arg16[%c0_20, %c0_21] : memref<8x1xf32, #tpu.memory_space<vmem>>, vector<8x1xf32>
      tpu.vector_store %arg16[%c0_20, %c0_21], %38 {strides = array<i32>} : memref<8x1xf32, #tpu.memory_space<vmem>>, vector<8x1xf32>,
      %c0_22 = arith.constant 0 : index
      %c0_23 = arith.constant 0 : index
      %40 = vector.load %arg17[%c0_22, %c0_23] : memref<8x1xf32, #tpu.memory_space<vmem>>, vector<8x1xf32>
      %41 = arith.mulf %32, %19 : vector<8x128xf32>
      %cst_24 = arith.constant dense<0.000000e+00> : vector<8xf32>
      %42 = vector.multi_reduction <add>, %41, %cst_24 [1] : vector<8x128xf32> to vector<8xf32>
      %43 = vector.shape_cast %42 : vector<8xf32> to vector<8x1xf32>
      %44 = arith.addf %40, %43 : vector<8x1xf32>
      %c0_25 = arith.constant 0 : index
      %c0_26 = arith.constant 0 : index
      %45 = vector.load %arg17[%c0_25, %c0_26] : memref<8x1xf32, #tpu.memory_space<vmem>>, vector<8x1xf32>
      tpu.vector_store %arg17[%c0_25, %c0_26], %44 {strides = array<i32>} : memref<8x1xf32, #tpu.memory_space<vmem>>, vector<8x1xf32>,
      %c0_27 = arith.constant 0 : index
      %c0_28 = arith.constant 0 : index
      %46 = vector.load %arg18[%c0_27, %c0_28] : memref<8x1xf32, #tpu.memory_space<vmem>>, vector<8x1xf32>
      %cst_29 = arith.constant dense<0.000000e+00> : vector<8xf32>
      %47 = vector.multi_reduction <add>, %34, %cst_29 [1] : vector<8x128xf32> to vector<8xf32>
      %48 = vector.shape_cast %47 : vector<8xf32> to vector<8x1xf32>
      %49 = arith.addf %46, %48 : vector<8x1xf32>
      %c0_30 = arith.constant 0 : index
      %c0_31 = arith.constant 0 : index
      %50 = vector.load %arg18[%c0_30, %c0_31] : memref<8x1xf32, #tpu.memory_space<vmem>>, vector<8x1xf32>
      tpu.vector_store %arg18[%c0_30, %c0_31], %49 {strides = array<i32>} : memref<8x1xf32, #tpu.memory_space<vmem>>, vector<8x1xf32>,
      %c0_32 = arith.constant 0 : index
      %c0_33 = arith.constant 0 : index
      %51 = vector.load %arg19[%c0_32, %c0_33] : memref<8x1xf32, #tpu.memory_space<vmem>>, vector<8x1xf32>
      %52 = arith.mulf %34, %24 : vector<8x128xf32>
      %cst_34 = arith.constant dense<0.000000e+00> : vector<8xf32>
      %53 = vector.multi_reduction <add>, %52, %cst_34 [1] : vector<8x128xf32> to vector<8xf32>
      %54 = vector.shape_cast %53 : vector<8xf32> to vector<8x1xf32>
      %55 = arith.addf %51, %54 : vector<8x1xf32>
      %c0_35 = arith.constant 0 : index
      %c0_36 = arith.constant 0 : index
      %56 = vector.load %arg19[%c0_35, %c0_36] : memref<8x1xf32, #tpu.memory_space<vmem>>, vector<8x1xf32>
      tpu.vector_store %arg19[%c0_35, %c0_36], %55 {strides = array<i32>} : memref<8x1xf32, #tpu.memory_space<vmem>>, vector<8x1xf32>,
    } else {
    }
    %c1_i32 = arith.constant 1 : i32
    %28 = arith.cmpi eq, %arg0, %c1_i32 : i32
    %29 = arith.extui %28 : i1 to i32
    %c0_i32_16 = arith.constant 0 : i32
    %30 = arith.cmpi ne, %29, %c0_i32_16 : i32
    scf.if %30 {
      %c0_17 = arith.constant 0 : index
      %c0_18 = arith.constant 0 : index
      %31 = vector.load %arg16[%c0_17, %c0_18] : memref<8x1xf32, #tpu.memory_space<vmem>>, vector<8x1xf32>
      %cst_19 = arith.constant 0.001953125 : f32
      %32 = vector.broadcast %cst_19 : f32 to vector<8x1xf32>
      %33 = arith.mulf %31, %32 : vector<8x1xf32>
      %c0_20 = arith.constant 0 : index
      %c0_21 = arith.constant 0 : index
      %34 = vector.load %arg17[%c0_20, %c0_21] : memref<8x1xf32, #tpu.memory_space<vmem>>, vector<8x1xf32>
      %cst_22 = arith.constant 0.001953125 : f32
      %35 = vector.broadcast %cst_22 : f32 to vector<8x1xf32>
      %36 = arith.mulf %34, %35 : vector<8x1xf32>
      %37 = arith.mulf %33, %33 : vector<8x1xf32>
      %38 = arith.subf %36, %37 : vector<8x1xf32>
      %c0_23 = arith.constant 0 : index
      %c0_24 = arith.constant 0 : index
      %39 = vector.load %arg9[%c0_23, %c0_24] : memref<8x1xf32, #tpu.memory_space<vmem>>, vector<8x1xf32>
      %cst_25 = arith.constant 9.99999974E-6 : f32
      %40 = vector.broadcast %cst_25 : f32 to vector<8x1xf32>
      %41 = arith.addf %38, %40 : vector<8x1xf32>
      %42 = math.rsqrt %41 : vector<8x1xf32>
      %43 = arith.mulf %39, %42 : vector<8x1xf32>
      %c0_26 = arith.constant 0 : index
      %c0_27 = arith.constant 0 : index
      %44 = vector.load %arg10[%c0_26, %c0_27] : memref<8x1xf32, #tpu.memory_space<vmem>>, vector<8x1xf32>
      %45 = arith.mulf %33, %43 : vector<8x1xf32>
      %46 = arith.subf %44, %45 : vector<8x1xf32>
      %c0_28 = arith.constant 0 : index
      %c0_29 = arith.constant 0 : index
      %47 = vector.load %arg18[%c0_28, %c0_29] : memref<8x1xf32, #tpu.memory_space<vmem>>, vector<8x1xf32>
      %cst_30 = arith.constant 0.001953125 : f32
      %48 = vector.broadcast %cst_30 : f32 to vector<8x1xf32>
      %49 = arith.mulf %47, %48 : vector<8x1xf32>
      %c0_31 = arith.constant 0 : index
      %c0_32 = arith.constant 0 : index
      %50 = vector.load %arg19[%c0_31, %c0_32] : memref<8x1xf32, #tpu.memory_space<vmem>>, vector<8x1xf32>
      %cst_33 = arith.constant 0.001953125 : f32
      %51 = vector.broadcast %cst_33 : f32 to vector<8x1xf32>
      %52 = arith.mulf %50, %51 : vector<8x1xf32>
      %53 = arith.mulf %49, %49 : vector<8x1xf32>
      %54 = arith.subf %52, %53 : vector<8x1xf32>
      %c0_34 = arith.constant 0 : index
      %c0_35 = arith.constant 0 : index
      %55 = vector.load %arg11[%c0_34, %c0_35] : memref<8x1xf32, #tpu.memory_space<vmem>>, vector<8x1xf32>
      %cst_36 = arith.constant 9.99999974E-6 : f32
      %56 = vector.broadcast %cst_36 : f32 to vector<8x1xf32>
      %57 = arith.addf %54, %56 : vector<8x1xf32>
      %58 = math.rsqrt %57 : vector<8x1xf32>
      %59 = arith.mulf %55, %58 : vector<8x1xf32>
      %c0_37 = arith.constant 0 : index
      %c0_38 = arith.constant 0 : index
      %60 = vector.load %arg12[%c0_37, %c0_38] : memref<8x1xf32, #tpu.memory_space<vmem>>, vector<8x1xf32>
      %61 = arith.mulf %49, %59 : vector<8x1xf32>
      %62 = arith.subf %60, %61 : vector<8x1xf32>
      %63 = vector.broadcast %43 : vector<8x1xf32> to vector<8x128xf32>
      %64 = arith.mulf %19, %63 : vector<8x128xf32>
      %65 = vector.broadcast %46 : vector<8x1xf32> to vector<8x128xf32>
      %66 = arith.addf %64, %65 : vector<8x128xf32>
      %67 = vector.broadcast %59 : vector<8x1xf32> to vector<8x128xf32>
      %68 = arith.mulf %24, %67 : vector<8x128xf32>
      %69 = arith.addf %66, %68 : vector<8x128xf32>
      %70 = vector.broadcast %62 : vector<8x1xf32> to vector<8x128xf32>
      %71 = arith.addf %69, %70 : vector<8x128xf32>
      %cst_39 = arith.constant 0.000000e+00 : f32
      %72 = vector.broadcast %cst_39 : f32 to vector<8x128xf32>
      %73 = arith.maximumf %71, %72 : vector<8x128xf32>
      %c0_40 = arith.constant 0 : index
      %c0_41 = arith.constant 0 : index
      %74 = vector.load %arg8[%c0_40, %c0_41] : memref<8x1xf32, #tpu.memory_space<vmem>>, vector<8x1xf32>
      %75 = vector.broadcast %74 : vector<8x1xf32> to vector<8x128xf32>
      %76 = arith.mulf %73, %75 : vector<8x128xf32>
      %cst_42 = arith.constant dense<0.000000e+00> : vector<128xf32>
      %77 = vector.multi_reduction <add>, %76, %cst_42 [0] : vector<8x128xf32> to vector<128xf32>
      %78 = vector.shape_cast %77 : vector<128xf32> to vector<1x128xf32>
      %c0_43 = arith.constant 0 : index
      %79 = memref.load %arg13[%c0_43] : memref<3xf32, #tpu.memory_space<smem>>
      %80 = vector.broadcast %79 : f32 to vector<1x128xf32>
      %81 = arith.addf %78, %80 : vector<1x128xf32>
      %82 = arith.mulf %81, %12 : vector<1x128xf32>
      %c0_44 = arith.constant 0 : index
      %c0_45 = arith.constant 0 : index
      %83 = vector.load %arg20[%c0_44, %c0_45] : memref<1x1xf32, #tpu.memory_space<vmem>>, vector<1x1xf32>
      %cst_46 = arith.constant dense<0.000000e+00> : vector<1xf32>
      %84 = vector.multi_reduction <add>, %82, %cst_46 [1] : vector<1x128xf32> to vector<1xf32>
      %85 = vector.shape_cast %84 : vector<1xf32> to vector<1x1xf32>
      %86 = arith.addf %83, %85 : vector<1x1xf32>
      %c0_47 = arith.constant 0 : index
      %c0_48 = arith.constant 0 : index
      %87 = vector.load %arg20[%c0_47, %c0_48] : memref<1x1xf32, #tpu.memory_space<vmem>>, vector<1x1xf32>
      tpu.vector_store %arg20[%c0_47, %c0_48], %86 {strides = array<i32>} : memref<1x1xf32, #tpu.memory_space<vmem>>, vector<1x1xf32>,
      %c0_49 = arith.constant 0 : index
      %c0_50 = arith.constant 0 : index
      %88 = vector.load %arg21[%c0_49, %c0_50] : memref<1x1xf32, #tpu.memory_space<vmem>>, vector<1x1xf32>
      %89 = arith.mulf %82, %81 : vector<1x128xf32>
      %cst_51 = arith.constant dense<0.000000e+00> : vector<1xf32>
      %90 = vector.multi_reduction <add>, %89, %cst_51 [1] : vector<1x128xf32> to vector<1xf32>
      %91 = vector.shape_cast %90 : vector<1xf32> to vector<1x1xf32>
      %92 = arith.addf %88, %91 : vector<1x1xf32>
      %c0_52 = arith.constant 0 : index
      %c0_53 = arith.constant 0 : index
      %93 = vector.load %arg21[%c0_52, %c0_53] : memref<1x1xf32, #tpu.memory_space<vmem>>, vector<1x1xf32>
      tpu.vector_store %arg21[%c0_52, %c0_53], %92 {strides = array<i32>} : memref<1x1xf32, #tpu.memory_space<vmem>>, vector<1x1xf32>,
      %c3_i32 = arith.constant 3 : i32
      %94 = arith.cmpi eq, %arg1, %c3_i32 : i32
      %95 = arith.extui %94 : i1 to i32
      %cst_54 = arith.constant 0.001953125 : f32
      %c0_i32_55 = arith.constant 0 : i32
      %96 = arith.cmpi ne, %95, %c0_i32_55 : i32
      scf.if %96 {
        %97 = tpu.concatenate %43, %46, %59, %62 in 1 : vector<8x1xf32>, vector<8x1xf32>, vector<8x1xf32>, vector<8x1xf32> -> vector<8x4xf32>
        %c0_56 = arith.constant 0 : index
        %c0_57 = arith.constant 0 : index
        %98 = vector.load %arg14[%c0_56, %c0_57] : memref<8x4xf32, #tpu.memory_space<vmem>>, vector<8x4xf32>
        tpu.vector_store %arg14[%c0_56, %c0_57], %97 {strides = array<i32>} : memref<8x4xf32, #tpu.memory_space<vmem>>, vector<8x4xf32>,
        %c0_58 = arith.constant 0 : index
        %c0_59 = arith.constant 0 : index
        %99 = vector.load %arg20[%c0_58, %c0_59] : memref<1x1xf32, #tpu.memory_space<vmem>>, vector<1x1xf32>
        %100 = vector.broadcast %cst_54 : f32 to vector<1x1xf32>
        %101 = arith.mulf %99, %100 : vector<1x1xf32>
        %c0_60 = arith.constant 0 : index
        %c0_61 = arith.constant 0 : index
        %102 = vector.load %arg21[%c0_60, %c0_61] : memref<1x1xf32, #tpu.memory_space<vmem>>, vector<1x1xf32>
        %103 = vector.broadcast %cst_54 : f32 to vector<1x1xf32>
        %104 = arith.mulf %102, %103 : vector<1x1xf32>
        %105 = arith.mulf %101, %101 : vector<1x1xf32>
        %106 = arith.subf %104, %105 : vector<1x1xf32>
        %c1 = arith.constant 1 : index
        %107 = memref.load %arg13[%c1] : memref<3xf32, #tpu.memory_space<smem>>
        %cst_62 = arith.constant 9.99999974E-6 : f32
        %108 = vector.broadcast %cst_62 : f32 to vector<1x1xf32>
        %109 = arith.addf %106, %108 : vector<1x1xf32>
        %110 = math.rsqrt %109 : vector<1x1xf32>
        %111 = vector.broadcast %107 : f32 to vector<1x1xf32>
        %112 = arith.mulf %111, %110 : vector<1x1xf32>
        %c2 = arith.constant 2 : index
        %113 = memref.load %arg13[%c2] : memref<3xf32, #tpu.memory_space<smem>>
        %114 = arith.mulf %101, %112 : vector<1x1xf32>
        %115 = vector.broadcast %113 : f32 to vector<1x1xf32>
        %116 = arith.subf %115, %114 : vector<1x1xf32>
        %117 = tpu.concatenate %112, %116 in 1 : vector<1x1xf32>, vector<1x1xf32> -> vector<1x2xf32>
        %c0_63 = arith.constant 0 : index
        %c0_64 = arith.constant 0 : index
        %118 = vector.load %arg15[%c0_63, %c0_64] : memref<1x2xf32, #tpu.memory_space<vmem>>, vector<1x2xf32>
        tpu.vector_store %arg15[%c0_63, %c0_64], %117 {strides = array<i32>} : memref<1x2xf32, #tpu.memory_space<vmem>>, vector<1x2xf32>,
      } else {
      }
    } else {
    }
    return
  }
  func.func @transform_0(%arg0: i32, %arg1: i32) -> (i32, i32) {
    %c0_i32 = arith.constant 0 : i32
    %c0_i32_0 = arith.constant 0 : i32
    return %c0_i32, %arg1 : i32, i32
  }
  func.func @transform_1(%arg0: i32, %arg1: i32) -> (i32, i32) {
    %c0_i32 = arith.constant 0 : i32
    %c0_i32_0 = arith.constant 0 : i32
    return %c0_i32, %arg1 : i32, i32
  }
  func.func @transform_2(%arg0: i32, %arg1: i32) -> (i32, i32) {
    %c0_i32 = arith.constant 0 : i32
    %c0_i32_0 = arith.constant 0 : i32
    %c0_i32_1 = arith.constant 0 : i32
    return %c0_i32, %c0_i32_0 : i32, i32
  }
  func.func @transform_3(%arg0: i32, %arg1: i32) -> (i32, i32) {
    %c0_i32 = arith.constant 0 : i32
    %c0_i32_0 = arith.constant 0 : i32
    %c0_i32_1 = arith.constant 0 : i32
    return %c0_i32, %c0_i32_0 : i32, i32
  }
  func.func @transform_4(%arg0: i32, %arg1: i32) -> (i32, i32) {
    %c0_i32 = arith.constant 0 : i32
    %c0_i32_0 = arith.constant 0 : i32
    %c0_i32_1 = arith.constant 0 : i32
    return %c0_i32, %c0_i32_0 : i32, i32
  }
  func.func @transform_5(%arg0: i32, %arg1: i32) -> (i32, i32) {
    %c0_i32 = arith.constant 0 : i32
    %c0_i32_0 = arith.constant 0 : i32
    %c0_i32_1 = arith.constant 0 : i32
    return %c0_i32, %c0_i32_0 : i32, i32
  }
  func.func @transform_6(%arg0: i32, %arg1: i32) -> (i32, i32) {
    %c0_i32 = arith.constant 0 : i32
    %c0_i32_0 = arith.constant 0 : i32
    %c0_i32_1 = arith.constant 0 : i32
    return %c0_i32, %c0_i32_0 : i32, i32
  }
  func.func @transform_7(%arg0: i32, %arg1: i32) -> (i32, i32) {
    %c0_i32 = arith.constant 0 : i32
    %c0_i32_0 = arith.constant 0 : i32
    %c0_i32_1 = arith.constant 0 : i32
    return %c0_i32, %c0_i32_0 : i32, i32
  }
  func.func @transform_8(%arg0: i32, %arg1: i32) -> (i32, i32) {
    %c0_i32 = arith.constant 0 : i32
    %c0_i32_0 = arith.constant 0 : i32
    %c0_i32_1 = arith.constant 0 : i32
    return %c0_i32, %c0_i32_0 : i32, i32
  }
  func.func @transform_9(%arg0: i32, %arg1: i32) -> (i32, i32) {
    %c0_i32 = arith.constant 0 : i32
    %c0_i32_0 = arith.constant 0 : i32
    %c0_i32_1 = arith.constant 0 : i32
    return %c0_i32, %c0_i32_0 : i32, i32
  }
  func.func @transform_10(%arg0: i32, %arg1: i32) -> (i32, i32) {
    %c0_i32 = arith.constant 0 : i32
    %c0_i32_0 = arith.constant 0 : i32
    %c0_i32_1 = arith.constant 0 : i32
    return %c0_i32, %c0_i32_0 : i32, i32
  }
  func.func @transform_11(%arg0: i32, %arg1: i32) -> i32 {
    %c0_i32 = arith.constant 0 : i32
    %c0_i32_0 = arith.constant 0 : i32
    return %c0_i32 : i32
  }
  func.func @transform_12(%arg0: i32, %arg1: i32) -> (i32, i32) {
    %c0_i32 = arith.constant 0 : i32
    %c0_i32_0 = arith.constant 0 : i32
    %c0_i32_1 = arith.constant 0 : i32
    return %c0_i32, %c0_i32_0 : i32, i32
  }
  func.func @transform_13(%arg0: i32, %arg1: i32) -> (i32, i32) {
    %c0_i32 = arith.constant 0 : i32
    %c0_i32_0 = arith.constant 0 : i32
    %c0_i32_1 = arith.constant 0 : i32
    return %c0_i32, %c0_i32_0 : i32, i32
  }
}

</mosaic_0001>

<bundles_post_ra>
// kernel: tpu_custom_call.1
= control target key start
LH: loop header
LB: loop body
LE: loop exit
PB: predicated region body
PF: predicated region fallthrough
CT: control target
= control target key end

     0   :  { %19 = vsyncpa [#allocation10], 0  ;;  %s1355_s0 = inlined_call_operand.vmem [shape: f32[4,512], index: 0, kind: input, shape index: {}]   ;;  %s1356_s1 = inlined_call_operand.vmem [shape: f32[4,512], index: 1, kind: input, shape index: {}]   ;;  %s1357_s2 = inlined_call_operand.vmem [shape: f32[8,4], index: 2, kind: input, shape index: {}]   ;;  %s1358_s3 = inlined_call_operand.vmem [shape: f32[8,1], index: 3, kind: input, shape index: {}]   ;;  %s1359_s4 = inlined_call_operand.vmem [shape: f32[8,4], index: 4, kind: input, shape index: {}]   ;;  %s1360_s5 = inlined_call_operand.vmem [shape: f32[8,1], index: 5, kind: input, shape index: {}]   ;;  %s1361_s6 = inlined_call_operand.vmem [shape: f32[8,1], index: 6, kind: input, shape index: {}]   ;;  %s1362_s7 = inlined_call_operand.vmem [shape: f32[8,1], index: 7, kind: input, shape index: {}]   ;;  %s1363_s8 = inlined_call_operand.vmem [shape: f32[8,1], index: 8, kind: input, shape index: {}]   ;;  %s1364_s9 = inlined_call_operand.vmem [shape: f32[8,1], index: 9, kind: input, shape index: {}]   ;;  %s1365_s10 = inlined_call_operand.vmem [shape: f32[8,1], index: 10, kind: input, shape index: {}]   ;;  %s1366_s11 = inlined_call_operand.vmem [shape: f32[3], index: 11, kind: input, shape index: {}]   ;;  %s1367_s12 = inlined_call_operand.vmem [shape: f32[8,4], index: 12, kind: output, shape index: {0}]   ;;  %s1368_s13 = inlined_call_operand.hbm [shape: f32[1,2], index: 13, kind: output, shape index: {1}]  }
   0x1   :  { %20 = vsyncpa [#allocation9], 0  ;;  %s1185_s25 = smov 0   ;;  %s1187_s26 = smov 0  }
   0x2   :  { %s1189_s27 = smov 0   ;;  %s1191_s28 = smov 0  }
   0x3   :  { %s1193_s29 = smov 0  }
   0x4 LB: > { %s904_s30 = sadd.s32 4294967295, %s1103_s29   ;;  %s35_s14 = sadd.s32 1, %s1095_s27  ;;  %s1103_s29 = sphi %s1193_s29, %s26_s29   ;;  %s1099_s28 = sphi %s1191_s28, %s1375_s28   ;;  %s1095_s27 = sphi %s1189_s27, %s1374_s27   ;;  %s1091_s26 = sphi %s1187_s26, %s1373_s26   ;;  %s1087_s25 = sphi %s1185_s25, %s1372_s25  }
   0x5   : > { %p36_p0 = scmp.ge.s32.totalorder %s35_s14, 4  ;;  %s38_s15 = sadd.s32 1, %s1099_s28 }
   0x6   : > { %p905_p1 = scmp.ge.s32.totalorder %s1103_s29, 1  ;;  %p347_p2 = scmp.lt.s32.totalorder %s1103_s29, 9 }
   0x7   : > { %s1377_s14 = smov (%p36_p0, %s35_s14), 0  ;;  %s1379_s15 = smov (!%p36_p0, %s38_s15), %s1099_s28 }
   0x8   : > { %p1218_p3 = pnand %p905_p1, %p347_p2  ;;  %p40_p4 = scmp.ge.s32.totalorder %s1379_s15, 2 }
   0x9   : > { %p1224_p5 = scmp.eq.s32.totalorder %s904_s30, 0  ;;  %s387_s20 = sshll.u32 %s1366_s11, 4  ;;  %s388_s20 = int_to_ptr.vmem [resolvable:$true] %s387_s20 }
   0xa   : > { %p949_p6 = pneg %p1218_p3  ;;  %s1381_s15 = smov (%p40_p4, %s1379_s15), 0 }
   0xb   : > { %s1016_s21 = scalar_lea.vmem %s388_s20, 16  ;;  %p1024_p12 = scmp.lt.s32.totalorder %s388_s20, %s388_s20 }
   0xc   : > { %p950_p7 = pnand %p1224_p5, %p949_p6  ;;  %p1017_p8 = scmp.ne.s32.totalorder %s388_s20, %s1016_s21 }
   0xd   : > { %p1025_p13 = scmp.lt.s32.totalorder %s1016_s21, %s1016_s21 }
   0xe   : > { %p1018_p9 = pneg %p950_p7 }
   0xf   : > { %p1026_p0 = por %p1025_p13, %p1024_p12 }
  0x10   : > { %p1019_p10 = pnand %p1018_p9, %p1017_p8 }
  0x12   : > { %p1020_p11 = pneg %p1019_p10 }
  0x14   : > { %p1027_p1 = pnand %p1026_p0, %p1020_p11 }
  0x16   : > { %1030 = shalt.err (!%p1027_p1)
}
  0x17   : > { %s1105_s22 = smov [#allocation8]   ;;  %414 = sbr.rel (%p1218_p3) target bundleno = 921 (0x399), region = 68 }
  0x18   : > { %952 = dma.vmem_to_smem (!%p950_p7), %s388_s20, 16, %s1105_s22, [#allocation10]  }
  0x1e   : > { %1078 = dma.done.wait (%p1224_p5), [#allocation10], 16  }
  0x1f   : > { %1080 = vsyncadd (%p1224_p5), [#allocation10], 4294967280 }
  0x20   : > { %420 = sfence }
  0x21   : > { %p457_p2 = scmp.lt.s32.totalorder %s1087_s25, 3  ;;  %p465_p4 = scmp.eq.s32.totalorder %s1091_s26, 0 }
  0x22   : > { %p466_p6 = scmp.eq.s32.totalorder %s1087_s25, 0 }
  0x23   : > { %s458_s23 = scalar_select %p457_p2, %s1087_s25, 3 }
  0x24   : > { %p467_p8 = pnand %p466_p6, %p465_p4 }
  0x25   : > { %s910_s24 = sshll.u32 %s458_s23, 2  ;;  %vm471_vm0 = vcmask (!%p467_p8), 7168   ;;  %vm476_vm1 = vcmask (!%p467_p8), 0   ;;  %v1106_v0 = vmov (!%p467_p8), 0.0  }
  0x26   : > { %s460_s19 = scalar_lea.vmem %s1355_s0, %s910_s24  ;;  %s464_s17 = scalar_lea.vmem %s1356_s1, %s910_s24  ;;  %472 = vst.msk [vmem:[#allocation2] sm:$0xff] (!%p467_p8), %vm471_vm0, %v1106_v0  ;;  %473 = vst.msk [vmem:[#allocation3] sm:$0xff] (!%p467_p8), %vm471_vm0, %v1106_v0 }
  0x27   : > { %470 = sbr.rel (%p467_p8) target bundleno = 46 (0x2e), region = 76  ;;  %474 = vst.msk [vmem:[#allocation4] sm:$0xff] (!%p467_p8), %vm471_vm0, %v1106_v0  ;;  %475 = vst.msk [vmem:[#allocation5] sm:$0xff] (!%p467_p8), %vm471_vm0, %v1106_v0 }
  0x28   : > { %477 = vst.msk [vmem:[#allocation6] sm:$0x1] (!%p467_p8), %vm476_vm1, %v1106_v0  ;;  %478 = vst.msk [vmem:[#allocation7] sm:$0x1] (!%p467_p8), %vm476_vm1, %v1106_v0 }
  0x2e PF: > { %s912_s22 = sshll.u32 %s1087_s25, 7  ;;  %v480_v1 = vlaneseq  ;;  %v487_v2 = vld [vmem:[%s460_s19] sm:$0xf]  ;;  %vm500_vm2 = vcmask 1043456   ;;  %v1107_v4 = vmov 0.0   ;;  %vm496_vm3 = vcmask 31744  }
  0x2f   : > { %v482_v3 = vstv %s912_s22  ;;  %931 = vmatprep.subr.mxu0 %v1107_v4  ;;  %936 = vmatprep.subr.mxu1 %v1107_v4  ;;  %v488_v5 = vld [vmem:[%s464_s17] sm:$0xf]  ;;  %vm1108_vm4 = vmmov 0   ;;  %v1109_v11 = vmov 0   ;;  %p918_p3 = scmp.ne.s32.totalorder %s1091_s26, 0 }
  0x30   : > { %v489_v6 = vld [vmem:[%s1357_s2] sm:$0xff]  ;;  %v481_v8 = vand.u32 127, %v480_v1  ;;  %932 = vmatpush3.msk.msra.mxu0 %vm500_vm2, %v487_v2  ;;  %933 = vmatprep.mubr.msk.f32.mxu0 %vm1108_vm4, %v1107_v4  ;;  %v674_v26 = vld [vmem:[#allocation4] sm:$0xff] (!%p918_p3)  ;;  %vm666_vm6 = vcmask (!%p918_p3), 7168   ;;  %v679_v32 = vld [vmem:[#allocation5] sm:$0xff] (!%p918_p3) }
  0x31   : > { %v574_v7 = vld [vmem:[%s1359_s4] sm:$0xff]  ;;  %937 = vmatpush3.msk.msra.mxu1 %vm500_vm2, %v488_v5  ;;  %938 = vmatprep.mubr.msk.f32.mxu1 %vm1108_vm4, %v1107_v4  ;;  %v668_v33 = vld [vmem:[#allocation3] sm:$0xff] (!%p918_p3) }
  0x32   : > { %v490_v9 = vld [vmem:[%s1358_s3] sm:$0xff]  ;;  %v483_v10 = vadd.s32 %v482_v3, %v481_v8  ;;  %934 = vmatmul.mubr.msk.f32.vlgmr.msra.gmra.mrb[0].mxu0 %vm496_vm3, %v489_v6  ;;  %939 = vmatmul.mubr.msk.f32.vlgmr.msra.gmra.mrb[0].mxu1 %vm496_vm3, %v574_v7 }
  0x33   : > { %1007 = vset.pattern.permute.xlu0 %v1109_v11  ;;  %v575_v13 = vld [vmem:[%s1360_s5] sm:$0xff] }
  0x34   : > { %vm484_vm5 = vcmp.lt.s32.totalorder %v483_v10, 512  ;;  %493 = vperm.xlu0 %1007, %v490_v9   ;;  %v662_v27 = vld [vmem:[#allocation2] sm:$0xff] (!%p918_p3) }
  0x35   : > { %v1266_v12 = vsel %vm484_vm5, 1.0, %v1107_v4 }
  0x38   : > { %578 = vperm.xlu0 %1007, %v575_v13  }
  0xb3   : > { %v494_v14 = vpop.permute.xlu0 %493 }
  0xb7   : > { %v579_v15 = vpop.permute.xlu0 %578 }
 0x100   : > { %659 = sbr.rel (%p918_p3) target bundleno = 415 (0x19f), region = 80 }
 0x105   : > { %v570_v16 = vpop.f32.mrb[0].mxu0  ;;  %v653_v17 = vpop.f32.mrb[0].mxu1 }
 0x106   : > { %v1271_v18 = vadd.f32 %v570_v16, %v494_v14  ;;  %v1273_v19 = vadd.f32 %v653_v17, %v579_v15  ;;  %v935_v20 = vpop.f32.mrb[1].mxu0  ;;  %v940_v21 = vpop.f32.mrb[1].mxu1 }
 0x108   : > { %v661_v22 = vmul.f32 %v1266_v12, %v1273_v19  ;;  %v660_v23 = vmul.f32 %v1266_v12, %v1271_v18 }
 0x10a   : > { %675 = vadd.xlane.f32.xlu1 %v661_v22  ;;  %663 = vadd.xlane.f32.xlu0 %v660_v23  ;;  %v680_v24 = vmul.f32 %v661_v22, %v1273_v19  ;;  %v669_v25 = vmul.f32 %v660_v23, %v1271_v18 }
 0x10e   : > { %681 = vadd.xlane.f32.xlu1 %v680_v24  ;;  %670 = vadd.xlane.f32.xlu0 %v669_v25 }
 0x197   : > { %v676_v28 = vpop.xlane.xlu1 %675  ;;  %v664_v29 = vpop.xlane.xlu0 %663 }
 0x198   : > { %v677_v30 = vadd.f32 %v676_v28, %v674_v26  ;;  %v665_v31 = vadd.f32 %v664_v29, %v662_v27 }
 0x19a   : > { %678 = vst.msk [vmem:[#allocation4] sm:$0xff] %vm666_vm6, %v677_v30  ;;  %667 = vst.msk [vmem:[#allocation2] sm:$0xff] %vm666_vm6, %v665_v31 }
 0x19b   : > { %v682_v34 = vpop.xlane.xlu1 %681  ;;  %v671_v35 = vpop.xlane.xlu0 %670 }
 0x19c   : > { %v683_v36 = vadd.f32 %v682_v34, %v679_v32  ;;  %v672_v37 = vadd.f32 %v671_v35, %v668_v33 }
 0x19e   : > { %684 = vst.msk [vmem:[#allocation5] sm:$0xff] %vm666_vm6, %v683_v36  ;;  %673 = vst.msk [vmem:[#allocation3] sm:$0xff] %vm666_vm6, %v672_v37 }
 0x19f PF: > { %p919_p5 = scmp.ne.s32.totalorder %s1091_s26, 1 }
 0x1a0   : > { %v1110_v40 = vmov (!%p919_p5), 0   ;;  %v708_v53 = vld [vmem:[%s1364_s9] sm:$0xff] (!%p919_p5)  ;;  %s754_s26 = sld [smem:[#allocation8]] (!%p919_p5)  ;;  %vm762_vm7 = vcmask (!%p919_p5), 0   ;;  %p920_p7 = scmp.ne.s32.totalorder (!%p919_p5), %s1087_s25, 3 }
 0x1a1   : > { %688 = sbr.rel (%p919_p5) target bundleno = 896 (0x380), region = 84  ;;  %v702_v38 = vld [vmem:[#allocation4] sm:$0xff] (!%p919_p5)  ;;  %1009 = vset.pattern.permute.xlu1 (!%p919_p5), %v1110_v40  ;;  %1008 = vset.pattern.permute.xlu0 (!%p919_p5), %v1110_v40  ;;  %v689_v43 = vld [vmem:[#allocation2] sm:$0xff] (!%p919_p5) }
 0x1a2   : > { %v703_v41 = vmul.f32 (!%p919_p5), 0.001953125, %v702_v38  ;;  %v690_v45 = vmul.f32 (!%p919_p5), 0.001953125, %v689_v43  ;;  %v695_v54 = vld [vmem:[%s1362_s7] sm:$0xff] (!%p919_p5) }
 0x1a3   : > { %v712_v59 = vld [vmem:[%s1365_s10] sm:$0xff] (!%p919_p5) }
 0x1a4   : > { %v706_v47 = vmul.f32 (!%p919_p5), %v703_v41, %v703_v41  ;;  %v693_v48 = vmul.f32 (!%p919_p5), %v690_v45, %v690_v45  ;;  %v699_v61 = vld [vmem:[%s1363_s8] sm:$0xff] (!%p919_p5) }
 0x1a5   : > { %v704_v39 = vld [vmem:[#allocation5] sm:$0xff] (!%p919_p5)  ;;  %v691_v44 = vld [vmem:[#allocation3] sm:$0xff] (!%p919_p5)  ;;  %v741_v2 = vld [vmem:[%s1361_s6] sm:$0xff] (!%p919_p5) }
 0x1a6   : > { %v705_v42 = vmul.f32 (!%p919_p5), 0.001953125, %v704_v39  ;;  %v692_v46 = vmul.f32 (!%p919_p5), 0.001953125, %v691_v44  ;;  %v755_v23 = vstv (!%p919_p5), %s754_s26  ;;  %v758_v26 = vld [vmem:[#allocation6] sm:$0x1] (!%p919_p5)  ;;  %v764_v28 = vld [vmem:[#allocation7] sm:$0x1] (!%p919_p5) }
 0x1a8   : > { %v707_v49 = vsub.f32 %v705_v42, %v706_v47  ;;  %v694_v50 = vsub.f32 %v692_v46, %v693_v48  ;;  %s1111_s22 = smov (!%p920_p7), 1   ;;  %s1112_s23 = smov (!%p920_p7), 3   ;;  %v807_v39 = vshrl.u32 (!%p920_p7), %v480_v1, 7  ;;  %vm783_vm8 = vcmask (!%p920_p7), 7168  }
 0x1a9   : > { %s1113_s24 = smov (!%p920_p7), 2   ;;  %s921_s18 = sld [smem:[#allocation8 + $0x1]] (!%p920_p7)  ;;  %vm785_vm9 = vcmask (!%p920_p7), 15360   ;;  %vm787_vm10 = vcmask (!%p920_p7), 23552   ;;  %vm814_vm11 = vcmask (!%p920_p7), 8192  }
 0x1aa   : > { %v709_v51 = vadd.f32 1e-05, %v707_v49  ;;  %v696_v52 = vadd.f32 1e-05, %v694_v50  ;;  %s922_s16 = sld [smem:[#allocation8 + $0x2]] (!%p920_p7)  ;;  %v808_v44 = vsub.s32 (!%p920_p7), 0, %v807_v39 }
 0x1ac   : > { %1010 = vrsqrt.f32 %v709_v51 }
 0x1ad   : > { %1012 = vrsqrt.f32 %v696_v52 }
 0x1af   : > { %v799_v38 = vstv (!%p920_p7), %s921_s18 }
 0x1b0   : > { %v803_v42 = vstv (!%p920_p7), %s922_s16 }
 0x1b6   : > { %v1011_v55 = vpop.eup %1010 }
 0x1b7   : > { %v1013_v56 = vpop.eup %1012  ;;  %v711_v57 = vmul.f32 %v1011_v55, %v708_v53 }
 0x1b8   : > { %v1289_v58 = vmul.f32 %v1013_v56, %v695_v54 }
 0x1b9   : > { %729 = vperm.xlu1 %1009, %v711_v57   ;;  %v713_v60 = vmul.f32 %v711_v57, %v703_v41 }
 0x1ba   : > { %717 = vperm.xlu0 %1008, %v1289_v58   ;;  %v700_v62 = vmul.f32 %v1289_v58, %v690_v45 }
 0x1bb   : > { %v714_v63 = vsub.f32 %v712_v59, %v713_v60 }
 0x1bc   : > { %v701_v0 = vsub.f32 %v699_v61, %v700_v62 }
 0x1bd   : > { %736 = vperm.xlu1 %1009, %v714_v63  }
 0x1be   : > { %723 = vperm.xlu0 %1008, %v701_v0  }
 0x1c2   : > { %744 = vperm.xlu0 %1008, %v741_v2  }
 0x238   : > { %v730_v4 = vpop.permute.xlu1 %729 }
 0x239   : > { %v718_v3 = vpop.permute.xlu0 %717  ;;  %v732_v5 = vmul.f32 %v730_v4, %v1273_v19 }
 0x23a   : > { %v720_v6 = vmul.f32 %v718_v3, %v1271_v18 }
 0x23c   : > { %v737_v10 = vpop.permute.xlu1 %736 }
 0x23d   : > { %v724_v7 = vpop.permute.xlu0 %723 }
 0x23e   : > { %v726_v8 = vadd.f32 %v724_v7, %v720_v6 }
 0x240   : > { %v733_v9 = vadd.f32 %v732_v5, %v726_v8 }
 0x241   : > { %v745_v14 = vpop.permute.xlu0 %744 }
 0x242   : > { %v739_v11 = vadd.f32 %v737_v10, %v733_v9 }
 0x244   : > { %v740_v13 = vmax.f32 %v739_v11, 0.0 }
 0x246   : > { %v747_v15 = vmul.f32 %v745_v14, %v740_v13 }
 0x248   : > { %v748_v16 = vrot.slane %v747_v15, 4 }
 0x24a   : > { %v749_v17 = vadd.f32 %v748_v16, %v747_v15 }
 0x24c   : > { %v750_v20 = vrot.slane %v749_v17, 2 }
 0x24e   : > { %v751_v21 = vadd.f32 %v750_v20, %v749_v17 }
 0x250   : > { %v752_v22 = vrot.slane %v751_v21, 1 }
 0x252   : > { %v753_v24 = vadd.f32 %v752_v22, %v751_v21 }
 0x254   : > { %v756_v25 = vadd.f32 %v755_v23, %v753_v24 }
 0x256   : > { %v757_v19 = vmul.f32 %v1266_v12, %v756_v25 }
 0x258   : > { %759 = vadd.xlane.f32.xlu1 %v757_v19  ;;  %v765_v18 = vmul.f32 %v757_v19, %v756_v25 }
 0x25a   : > { %766 = vadd.xlane.f32.xlu0 %v765_v18 }
 0x269   : > { %780 = vrot.lane.b32.xlu1 (!%p920_p7), %v714_v63, %s1112_s23 }
 0x270   : > { %774 = vrot.lane.b32.xlu0 (!%p920_p7), %v701_v0, %s1111_s22 }
 0x274   : > { %777 = vrot.lane.b32.xlu0 (!%p920_p7), %v711_v57, %s1113_s24 }
 0x2e4   : > { %773 = sbr.rel (%p920_p7) target bundleno = 896 (0x380), region = 88 }
 0x2e5   : > { %v760_v27 = vpop.xlane.xlu1 %759 }
 0x2e6   : > { %v761_v29 = vadd.f32 %v760_v27, %v758_v26 }
 0x2e7   : > { %v767_v30 = vpop.xlane.xlu0 %766 }
 0x2e8   : > { %763 = vst.msk [vmem:[#allocation6] sm:$0x1] %vm762_vm7, %v761_v29  ;;  %v768_v31 = vadd.f32 %v767_v30, %v764_v28 }
 0x2e9   : > { %v781_v49 = vpop.permute.xlu1 (!%p920_p7), %780 }
 0x2ea   : > { %769 = vst.msk [vmem:[#allocation7] sm:$0x1] %vm762_vm7, %v768_v31 }
 0x2eb   : > { %v775_v47 = vpop.permute.xlu0 %774 }
 0x2ec   : > { %v784_v48 = vsel %vm783_vm8, %v1289_v58, %v775_v47 }
 0x2ef   : > { %v790_v32 = vld [vmem:[#allocation6] sm:$0x1]  ;;  %v778_v50 = vpop.permute.xlu0 %777 }
 0x2f0   : > { %v791_v12 = vmul.f32 0.001953125, %v790_v32  ;;  %v786_v51 = vsel %vm785_vm9, %v784_v48, %v778_v50 }
 0x2f1   : > { %v792_v33 = vld [vmem:[#allocation7] sm:$0x1]  ;;  %v788_v52 = vsel %vm787_vm10, %v786_v51, %v781_v49 }
 0x2f2   : > { %v793_v34 = vmul.f32 0.001953125, %v792_v33  ;;  %v794_v35 = vmul.f32 %v791_v12, %v791_v12  ;;  %789 = vst.msk [vmem:[%s1367_s12] sm:$0xff] %vm496_vm3, %v788_v52 }
 0x2f4   : > { %v795_v36 = vsub.f32 %v793_v34, %v794_v35 }
 0x2f6   : > { %v797_v37 = vadd.f32 1e-05, %v795_v36 }
 0x2f8   : > { %1014 = vrsqrt.f32 %v797_v37 }
 0x302   : > { %v1015_v40 = vpop.eup %1014 }
 0x303   : > { %v800_v41 = vmul.f32 %v1015_v40, %v799_v38 }
 0x305   : > { %v802_v43 = vmul.f32 %v800_v41, %v791_v12 }
 0x307   : > { %v804_v45 = vsub.f32 %v803_v42, %v802_v43 }
 0x309   : > { %v809_v46 = vrot.slane %v804_v45, %v808_v44 }
 0x30b   : > { %810 = vrot.lane.b32.xlu1 %v809_v46, %s1111_s22 }
 0x37d   : > { %v811_v1 = vpop.permute.xlu1 %810 }
 0x37e   : > { %v813_v53 = vsel %vm783_vm8, %v800_v41, %v811_v1 }
 0x37f   : > { %815 = vst.msk [vmem:[#allocation11] sm:$0x1] %vm814_vm11, %v813_v53 }
 0x380 PF: > { %p1314_p9 = scmp.eq.s32.totalorder %s904_s30, 7  ;;  %s1114_s21 = smov [#allocation11]  }
 0x381   : > { %s826_s17 = sshll.u32 %s1114_s21, 4  ;;  %s827_s17 = int_to_ptr.vmem [resolvable:$true] %s826_s17 }
 0x382   : > { %s1031_s26 = scalar_lea.vmem %s827_s17, 16  ;;  %s1037_s22 = scalar_lea.vmem %s827_s17, 32 }
 0x383   : > { %p1032_p10 = scmp.ne.s32.totalorder %s827_s17, %s1031_s26  ;;  %p1038_p13 = scmp.lt.s32.totalorder %s827_s17, %s827_s17 }
 0x384   : > { %p1039_p0 = scmp.lt.s32.totalorder %s1037_s22, %s1031_s26 }
 0x385   : > { %p1033_p11 = pnand %p1032_p10, %p1314_p9 }
 0x386   : > { %p1040_p1 = por %p1039_p0, %p1038_p13 }
 0x387   : > { %p1034_p12 = pneg %p1033_p11 }
 0x389   : > { %p1041_p2 = pnand %p1040_p1, %p1034_p12 }
 0x38b   : > { %1044 = shalt.err (!%p1041_p2)
}
 0x38c   : > { %s1045_s24 = scalar_lea.hbm %s1368_s13, 16 }
 0x38d   : > { %p1046_p4 = scmp.ne.s32.totalorder %s1368_s13, %s1045_s24  ;;  %p1051_p3 = scmp.lt.u32.totalorder %s1045_s24, %s1368_s13 }
 0x38f   : > { %p1047_p6 = pnand %p1046_p4, %p1314_p9 }
 0x391   : > { %p1048_p8 = pneg %p1047_p6 }
 0x393   : > { %p1053_p5 = pnand %p1051_p3, %p1048_p8 }
 0x395   : > { %1056 = shalt.err (!%p1053_p5)
}
 0x396   : > { %946 = dma.vmem_to_hbm [thread:$0]  (%p1314_p9), %s827_s17, 16, %s1368_s13, [#allocation9]  }
 0x397   : > { %1082 = dma.done.wait (%p1314_p9), [#allocation9], 16  }
 0x398   : > { %1084 = vsyncadd (%p1314_p9), [#allocation9], 4294967280 }
 0x399 PF: > { %s26_s29 = sadd.s32 1, %s1103_s29   ;;  %s1372_s25 = smov %s1095_s27 }
 0x39a   : > { %p23_p7 = scmp.ge.s32.totalorder %s26_s29, 10   ;;  %s1373_s26 = smov %s1099_s28 }
 0x39b   : > { %s1374_s27 = smov %s1377_s14  ;;  %s1375_s28 = smov %s1381_s15 }
 0x39c   :  { %25 = sbr.rel (!%p23_p7) target bundleno = 4 (0x4), region = 127 }
 0x3a3   :  { %842 = vsyncpa [#allocation9], 1 }
 0x3a4   :  { %844 = vsyncpa [#allocation9 + $0x1], 1 }
 0x3a5   :  { %845 = vsyncpa [#allocation10], 1 }
 0x3a6   :  { %847 = vsyncpa [#allocation10 + $0x1], 1 }

</bundles_post_ra>
